<compile_context>
chip_gen: v7x
topology: tpu7x:2x2x1
jax: 0.10.0
libtpu: 0.0.40
codegen_flags: <defaults>
</compile_context>

<pallas_src>
import functools

import jax
import jax.numpy as jnp
from jax.experimental import pallas as pl
from jax.experimental.pallas import tpu as pltpu


FPAD = 128      # lane-padded feature width used for every layer
TILE_M = 128    # node-row tile (sublane axis); Npad is rounded up to this


def _round_up(x, m):
    return (x + m - 1) // m * m


# -----------------------------------------------------------------------------
# Fused Pallas kernel: all GCN layers + final log_softmax
# -----------------------------------------------------------------------------
def fused_gcn_kernel(a_ref, x_ref, w_ref, b_ref, o_ref, h_scr, xw_scr,
                     *, tile_m, valid_out_dim):
    """Grid = (num_layers_total, n_pad // tile_m).

    a_ref : (tile_m, n_pad)  bf16   row tile of normalized adjacency Â
    x_ref : (n_pad, FPAD)    bf16   padded input features (resident block)
    w_ref : (1, FPAD, FPAD)  bf16   weight of the current layer
    b_ref : (1, 1, FPAD)     f32    bias of the current layer
    o_ref : (tile_m, FPAD)   f32    output row tile (final = log_softmax logits)
    h_scr : (n_pad, FPAD)    bf16   VMEM-resident activation H (persists)
    xw_scr: (n_pad, FPAD)    bf16   VMEM-resident H @ W_l (hoisted per layer)
    """
    l = pl.program_id(0)
    i = pl.program_id(1)
    last_layer = pl.num_programs(0) - 1

    # Load padded input features into the resident activation buffer once.
    @pl.when(jnp.logical_and(l == 0, i == 0))
    def _():
        h_scr[...] = x_ref[...]

    # Hoist the small matmul: compute H @ W_l once per layer (at row tile 0).
    # h_scr holds the fully-updated activations of the previous layer because
    # the layer axis is the outermost (sequential) grid axis.
    @pl.when(i == 0)
    def _():
        xw = jnp.dot(h_scr[...], w_ref[0], preferred_element_type=jnp.float32)
        xw_scr[...] = xw.astype(jnp.bfloat16)

    # Aggregate rows [i*tile_m, (i+1)*tile_m):  Â_tile @ (H W_l) + b, ReLU (f32).
    acc = jnp.dot(a_ref[...], xw_scr[...], preferred_element_type=jnp.float32)
    acc = jnp.maximum(acc + b_ref[0], 0.0)
    # dropout: eval mode -> identity (no-op).

    @pl.when(l != last_layer)
    def _():
        row0 = pl.multiple_of(i * tile_m, tile_m)
        h_scr[pl.ds(row0, tile_m), :] = acc.astype(jnp.bfloat16)
        o_ref[...] = acc      # deterministic writeback; overwritten by last layer

    @pl.when(l == last_layer)
    def _():
        # Row-wise log_softmax over the valid (unpadded) output lanes.
        lane = jax.lax.broadcasted_iota(jnp.int32, acc.shape, 1)
        valid = lane < valid_out_dim
        z = jnp.where(valid, acc, -1e30)
        m = jnp.max(z, axis=1, keepdims=True)
        s = z - m
        e = jnp.where(valid, jnp.exp(s), 0.0)
        lse = jnp.log(jnp.sum(e, axis=1, keepdims=True))
        o_ref[...] = jnp.where(valid, s - lse, 0.0)


# -----------------------------------------------------------------------------
# Glue: normalized adjacency, parameters, padding, single pallas_call
# -----------------------------------------------------------------------------
def build_normalized_adjacency(edge_index, num_nodes):
    """Â = D^{-1/2} (A + I) D^{-1/2}; duplicate edges accumulate (like PyG)."""
    src, dst = edge_index[0], edge_index[1]
    a = jnp.zeros((num_nodes, num_nodes), jnp.float32).at[dst, src].add(1.0)
    a = a + jnp.eye(num_nodes, dtype=jnp.float32)          # self loops
    deg = jnp.sum(a, axis=1)
    d_inv_sqrt = jnp.where(deg > 0, jax.lax.rsqrt(deg), 0.0)
    return d_inv_sqrt[:, None] * a * d_inv_sqrt[None, :]


def init_params(key, input_dim, hidden_dim, output_dim, num_layers):
    """Glorot-uniform weights / zero biases for num_layers + 1 GCNConv layers."""
    dims = [input_dim] + [hidden_dim] * num_layers + [output_dim]
    params = []
    for i in range(len(dims) - 1):
        key, sub = jax.random.split(key)
        fan_in, fan_out = dims[i], dims[i + 1]
        limit = jnp.sqrt(6.0 / (fan_in + fan_out))
        w = jax.random.uniform(sub, (fan_in, fan_out), jnp.float32, -limit, limit)
        b = jnp.zeros((fan_out,), jnp.float32)
        params.append((w, b))
    return params


@functools.partial(jax.jit, static_argnames=("num_nodes", "output_dim"))
def gnn_forward(x, edge_index, params, num_nodes, output_dim):
    num_layers_total = len(params)                    # num_layers + 1 convs
    n_pad = max(_round_up(num_nodes, TILE_M), TILE_M)
    input_dim = x.shape[1]
    assert input_dim <= FPAD and output_dim <= FPAD
    assert all(w.shape[0] <= FPAD and w.shape[1] <= FPAD for w, _ in params)

    # --- build + pad operands (plain JAX glue) -------------------------------
    a_hat = build_normalized_adjacency(edge_index, num_nodes)
    a_pad = (jnp.zeros((n_pad, n_pad), jnp.float32)
             .at[:num_nodes, :num_nodes].set(a_hat)).astype(jnp.bfloat16)
    x_pad = (jnp.zeros((n_pad, FPAD), jnp.float32)
             .at[:num_nodes, :input_dim].set(x)).astype(jnp.bfloat16)
    w_stack = jnp.stack([
        jnp.zeros((FPAD, FPAD), jnp.float32).at[:w.shape[0], :w.shape[1]].set(w)
        for w, _ in params
    ]).astype(jnp.bfloat16)                                    # (L, FPAD, FPAD)
    b_stack = jnp.stack([
        jnp.zeros((1, FPAD), jnp.float32).at[0, :b.shape[0]].set(b)
        for _, b in params
    ])                                                         # (L, 1, FPAD)

    n_tiles = n_pad // TILE_M
    kernel = functools.partial(fused_gcn_kernel,
                               tile_m=TILE_M, valid_out_dim=output_dim)

    flops = 2 * num_layers_total * (n_pad * FPAD * FPAD + n_pad * n_pad * FPAD)
    bytes_accessed = (num_layers_total * n_pad * n_pad * 2   # Â streamed per layer
                      + n_pad * FPAD * 2                     # X
                      + w_stack.size * 2 + b_stack.size * 4
                      + n_pad * FPAD * 4)                    # output
    cost = pl.CostEstimate(flops=int(flops),
                           transcendentals=int(n_pad * FPAD),
                           bytes_accessed=int(bytes_accessed))

    out_pad = pl.pallas_call(
        kernel,
        out_shape=jax.ShapeDtypeStruct((n_pad, FPAD), jnp.float32),
        grid_spec=pltpu.PrefetchScalarGridSpec(
            num_scalar_prefetch=0,
            grid=(num_layers_total, n_tiles),
            in_specs=[
                pl.BlockSpec((TILE_M, n_pad), lambda l, i: (i, 0)),     # Â row tile
                pl.BlockSpec((n_pad, FPAD), lambda l, i: (0, 0)),       # X (resident)
                pl.BlockSpec((1, FPAD, FPAD), lambda l, i: (l, 0, 0)),  # W_l
                pl.BlockSpec((1, 1, FPAD), lambda l, i: (l, 0, 0)),     # b_l
            ],
            out_specs=pl.BlockSpec((TILE_M, FPAD), lambda l, i: (i, 0)),
            scratch_shapes=[
                pltpu.VMEM((n_pad, FPAD), jnp.bfloat16),   # activation H
                pltpu.VMEM((n_pad, FPAD), jnp.bfloat16),   # H @ W_l (hoisted)
            ],
        ),
        compiler_params=pltpu.CompilerParams(
            dimension_semantics=("arbitrary", "arbitrary"),
            vmem_limit_bytes=32 * 1024 * 1024,
        ),
        cost_estimate=cost,
    )(a_pad, x_pad, w_stack, b_stack)

    return out_pad[:num_nodes, :output_dim]


# -----------------------------------------------------------------------------
if __name__ == "__main__":
    # Small, TPU-friendly synthetic shapes consistent with the module.
    num_nodes = 16
    input_dim = 16
    hidden_features = 32      # args.hidden_features
    output_dim = 8
    num_layers = 2            # args.num_layers -> num_layers + 1 GCNConv layers

    key = jax.random.PRNGKey(0)
    k_x, k_e, k_p = jax.random.split(key, 3)

    x = jax.random.normal(k_x, (num_nodes, input_dim), jnp.float32)

    num_edges = 48
    src = jax.random.randint(k_e, (num_edges,), 0, num_nodes)
    dst = jax.random.randint(jax.random.fold_in(k_e, 1), (num_edges,), 0, num_nodes)
    edge_index = jnp.stack([src, dst], axis=0).astype(jnp.int32)   # (2, E)

    params = init_params(k_p, input_dim, hidden_features, output_dim, num_layers)

    out = gnn_forward(x, edge_index, params, num_nodes, output_dim)
    jax.block_until_ready(out)

    assert out.shape == (num_nodes, output_dim)
    # log_softmax rows must sum (in prob space) to ~1.
    row_sums = jnp.sum(jnp.exp(out), axis=1)
    assert bool(jnp.all(jnp.abs(row_sums - 1.0) < 1e-3))

    # Pure-JAX reference for a correctness sanity check.
    a_hat = build_normalized_adjacency(edge_index, num_nodes)
    h = x
    for w, b in params:
        h = jnp.maximum(a_hat @ (h @ w) + b, 0.0)
    ref = jax.nn.log_softmax(h, axis=1)
    assert bool(jnp.max(jnp.abs(out - ref)) < 5e-2)   # bf16 MXU tolerance

    print("KERNEL_OK")
</pallas_src>

<mosaic_0001>
module attributes {stable_mosaic.version = 11 : i64} {
  func.func private @main(%arg0: i32) attributes {dimension_semantics = [#tpu.dimension_semantics<core_parallel>], iteration_bounds = array<i64: 2>, tpu.core_type = #tpu.core_type<sc_scalar_subcore>, window_params = []} {
    return
  }
}

module attributes {stable_mosaic.version = 11 : i64} {
  func.func private @main(%arg0: i32) attributes {dimension_semantics = [#tpu.dimension_semantics<core_parallel>], iteration_bounds = array<i64: 2>, tpu.core_type = #tpu.core_type<sc_scalar_subcore>, window_params = []} {
    return
  }
}

module attributes {stable_mosaic.version = 11 : i64} {
  func.func @fused_gcn_kernel(%arg0: i32, %arg1: i32, %arg2: memref<128x128xbf16, #tpu.memory_space<vmem>>, %arg3: memref<128x128xbf16, #tpu.memory_space<vmem>>, %arg4: memref<1x128x128xbf16, #tpu.memory_space<vmem>>, %arg5: memref<1x1x128xf32, #tpu.memory_space<vmem>>, %arg6: memref<128x128xf32, #tpu.memory_space<vmem>>, %arg7: memref<128x128xbf16, #tpu.memory_space<vmem>>, %arg8: memref<128x128xbf16, #tpu.memory_space<vmem>>) attributes {dimension_semantics = [#tpu.dimension_semantics<arbitrary>, #tpu.dimension_semantics<arbitrary>], iteration_bounds = array<i64: 3, 1>, scalar_prefetch = 0 : i64, scratch_operands = 2 : i64, tpu.core_type = #tpu.core_type<tc>, window_params = [{transform_indices = @transform_0, window_bounds = array<i64: 128, 128>}, {pipeline_mode = #tpu.pipeline_mode<synchronous>, transform_indices = @transform_1, window_bounds = array<i64: 128, 128>}, {transform_indices = @transform_2, window_bounds = array<i64: 1, 128, 128>}, {transform_indices = @transform_3, window_bounds = array<i64: 1, 1, 128>}, {transform_indices = @transform_4, window_bounds = array<i64: 128, 128>}]} {
    %c0_i32 = arith.constant 0 : i32
    %0 = arith.cmpi eq, %arg0, %c0_i32 : i32
    %c0_i32_0 = arith.constant 0 : i32
    %1 = arith.cmpi eq, %arg1, %c0_i32_0 : i32
    %2 = arith.andi %0, %1 : i1
    %3 = arith.extui %2 : i1 to i32
    %c0_i32_1 = arith.constant 0 : i32
    %4 = arith.cmpi ne, %3, %c0_i32_1 : i32
    scf.if %4 {
      %c0_14 = arith.constant 0 : index
      %c0_15 = arith.constant 0 : index
      %23 = vector.load %arg3[%c0_14, %c0_15] : memref<128x128xbf16, #tpu.memory_space<vmem>>, vector<128x128xbf16>
      %c0_16 = arith.constant 0 : index
      %c0_17 = arith.constant 0 : index
      %24 = vector.load %arg7[%c0_16, %c0_17] : memref<128x128xbf16, #tpu.memory_space<vmem>>, vector<128x128xbf16>
      tpu.vector_store %arg7[%c0_16, %c0_17], %23 {strides = array<i32>} : memref<128x128xbf16, #tpu.memory_space<vmem>>, vector<128x128xbf16>,
    } else {
    }
    %c0_i32_2 = arith.constant 0 : i32
    %5 = arith.cmpi eq, %arg1, %c0_i32_2 : i32
    %6 = arith.extui %5 : i1 to i32
    %c0_i32_3 = arith.constant 0 : i32
    %7 = arith.cmpi ne, %6, %c0_i32_3 : i32
    scf.if %7 {
      %c0_14 = arith.constant 0 : index
      %c0_15 = arith.constant 0 : index
      %23 = vector.load %arg7[%c0_14, %c0_15] : memref<128x128xbf16, #tpu.memory_space<vmem>>, vector<128x128xbf16>
      %c0_16 = arith.constant 0 : index
      %c0_17 = arith.constant 0 : index
      %c0_18 = arith.constant 0 : index
      %24 = vector.load %arg4[%c0_16, %c0_17, %c0_18] : memref<1x128x128xbf16, #tpu.memory_space<vmem>>, vector<1x128x128xbf16>
      %25 = vector.shape_cast %24 : vector<1x128x128xbf16> to vector<128x128xbf16>
      %cst_19 = arith.constant dense<0.000000e+00> : vector<128x128xf32>
      %26 = tpu.matmul %23, %25, %cst_19 {dimension_numbers = #tpu.dot_dimension_numbers<[1], [0], [0], [1], [0, 0, 1, 1], [], []>} : vector<128x128xbf16>, vector<128x128xbf16>, vector<128x128xf32> -> vector<128x128xf32>
      %27 = arith.truncf %26 : vector<128x128xf32> to vector<128x128xbf16>
      %c0_20 = arith.constant 0 : index
      %c0_21 = arith.constant 0 : index
      %28 = vector.load %arg8[%c0_20, %c0_21] : memref<128x128xbf16, #tpu.memory_space<vmem>>, vector<128x128xbf16>
      tpu.vector_store %arg8[%c0_20, %c0_21], %27 {strides = array<i32>} : memref<128x128xbf16, #tpu.memory_space<vmem>>, vector<128x128xbf16>,
    } else {
    }
    %c0 = arith.constant 0 : index
    %c0_4 = arith.constant 0 : index
    %8 = vector.load %arg2[%c0, %c0_4] : memref<128x128xbf16, #tpu.memory_space<vmem>>, vector<128x128xbf16>
    %c0_5 = arith.constant 0 : index
    %c0_6 = arith.constant 0 : index
    %9 = vector.load %arg8[%c0_5, %c0_6] : memref<128x128xbf16, #tpu.memory_space<vmem>>, vector<128x128xbf16>
    %cst = arith.constant dense<0.000000e+00> : vector<128x128xf32>
    %10 = tpu.matmul %8, %9, %cst {dimension_numbers = #tpu.dot_dimension_numbers<[1], [0], [0], [1], [0, 0, 1, 1], [], []>} : vector<128x128xbf16>, vector<128x128xbf16>, vector<128x128xf32> -> vector<128x128xf32>
    %c0_7 = arith.constant 0 : index
    %c0_8 = arith.constant 0 : index
    %c0_9 = arith.constant 0 : index
    %11 = vector.load %arg5[%c0_7, %c0_8, %c0_9] : memref<1x1x128xf32, #tpu.memory_space<vmem>>, vector<1x1x128xf32>
    %12 = vector.shape_cast %11 : vector<1x1x128xf32> to vector<1x128xf32>
    %13 = vector.broadcast %12 : vector<1x128xf32> to vector<128x128xf32>
    %14 = arith.addf %10, %13 : vector<128x128xf32>
    %cst_10 = arith.constant 0.000000e+00 : f32
    %15 = vector.broadcast %cst_10 : f32 to vector<128x128xf32>
    %16 = arith.maximumf %14, %15 : vector<128x128xf32>
    %c2_i32 = arith.constant 2 : i32
    %17 = arith.cmpi ne, %arg0, %c2_i32 : i32
    %18 = arith.extui %17 : i1 to i32
    %c0_i32_11 = arith.constant 0 : i32
    %19 = arith.cmpi ne, %18, %c0_i32_11 : i32
    scf.if %19 {
      %c128_i32 = arith.constant 128 : i32
      %23 = arith.muli %arg1, %c128_i32 : i32
      %24 = tpu.assume_multiple %23, 128 : i32
      %25 = arith.truncf %16 : vector<128x128xf32> to vector<128x128xbf16>
      %26 = arith.index_cast %24 : i32 to index
      %c0_14 = arith.constant 0 : index
      %27 = vector.load %arg7[%26, %c0_14] : memref<128x128xbf16, #tpu.memory_space<vmem>>, vector<128x128xbf16>
      tpu.vector_store %arg7[%26, %c0_14], %25 {strides = array<i32>} : memref<128x128xbf16, #tpu.memory_space<vmem>>, vector<128x128xbf16>,
      %c0_15 = arith.constant 0 : index
      %c0_16 = arith.constant 0 : index
      %28 = vector.load %arg6[%c0_15, %c0_16] : memref<128x128xf32, #tpu.memory_space<vmem>>, vector<128x128xf32>
      tpu.vector_store %arg6[%c0_15, %c0_16], %16 {strides = array<i32>} : memref<128x128xf32, #tpu.memory_space<vmem>>, vector<128x128xf32>,
    } else {
    }
    %c2_i32_12 = arith.constant 2 : i32
    %20 = arith.cmpi eq, %arg0, %c2_i32_12 : i32
    %21 = arith.extui %20 : i1 to i32
    %c0_i32_13 = arith.constant 0 : i32
    %22 = arith.cmpi ne, %21, %c0_i32_13 : i32
    scf.if %22 {
      %23 = tpu.iota {dimensions = array<i32: 1>} : vector<128x128xi32>
      %c8_i32 = arith.constant 8 : i32
      %24 = vector.broadcast %c8_i32 : i32 to vector<128x128xi32>
      %25 = arith.cmpi slt, %23, %24 : vector<128x128xi32>
      %cst_14 = arith.constant -1.000000e+30 : f32
      %26 = vector.broadcast %cst_14 : f32 to vector<128x128xf32>
      %27 = arith.select %25, %16, %26 : vector<128x128xi1>, vector<128x128xf32>
      %cst_15 = arith.constant dense<0xFF800000> : vector<128xf32>
      %28 = vector.multi_reduction <maximumf>, %27, %cst_15 [1] : vector<128x128xf32> to vector<128xf32>
      %29 = vector.shape_cast %28 : vector<128xf32> to vector<128x1xf32>
      %30 = vector.broadcast %29 : vector<128x1xf32> to vector<128x128xf32>
      %31 = arith.subf %27, %30 : vector<128x128xf32>
      %32 = math.exp %31 : vector<128x128xf32>
      %cst_16 = arith.constant 0.000000e+00 : f32
      %33 = vector.broadcast %cst_16 : f32 to vector<128x128xf32>
      %34 = arith.select %25, %32, %33 : vector<128x128xi1>, vector<128x128xf32>
      %cst_17 = arith.constant dense<0.000000e+00> : vector<128xf32>
      %35 = vector.multi_reduction <add>, %34, %cst_17 [1] : vector<128x128xf32> to vector<128xf32>
      %36 = vector.shape_cast %35 : vector<128xf32> to vector<128x1xf32>
      %37 = math.log %36 : vector<128x1xf32>
      %38 = vector.broadcast %37 : vector<128x1xf32> to vector<128x128xf32>
      %39 = arith.subf %31, %38 : vector<128x128xf32>
      %cst_18 = arith.constant 0.000000e+00 : f32
      %40 = vector.broadcast %cst_18 : f32 to vector<128x128xf32>
      %41 = arith.select %25, %39, %40 : vector<128x128xi1>, vector<128x128xf32>
      %c0_19 = arith.constant 0 : index
      %c0_20 = arith.constant 0 : index
      %42 = vector.load %arg6[%c0_19, %c0_20] : memref<128x128xf32, #tpu.memory_space<vmem>>, vector<128x128xf32>
      tpu.vector_store %arg6[%c0_19, %c0_20], %41 {strides = array<i32>} : memref<128x128xf32, #tpu.memory_space<vmem>>, vector<128x128xf32>,
    } else {
    }
    return
  }
  func.func @transform_0(%arg0: i32, %arg1: i32) -> (i32, i32) {
    %c0_i32 = arith.constant 0 : i32
    %c0_i32_0 = arith.constant 0 : i32
    return %arg1, %c0_i32 : i32, i32
  }
  func.func @transform_1(%arg0: i32, %arg1: i32) -> (i32, i32) {
    %c0_i32 = arith.constant 0 : i32
    %c0_i32_0 = arith.constant 0 : i32
    %c0_i32_1 = arith.constant 0 : i32
    return %c0_i32, %c0_i32_0 : i32, i32
  }
  func.func @transform_2(%arg0: i32, %arg1: i32) -> (i32, i32, i32) {
    %c0_i32 = arith.constant 0 : i32
    %c0_i32_0 = arith.constant 0 : i32
    %c0_i32_1 = arith.constant 0 : i32
    return %arg0, %c0_i32, %c0_i32_0 : i32, i32, i32
  }
  func.func @transform_3(%arg0: i32, %arg1: i32) -> (i32, i32, i32) {
    %c0_i32 = arith.constant 0 : i32
    %c0_i32_0 = arith.constant 0 : i32
    %c0_i32_1 = arith.constant 0 : i32
    return %arg0, %c0_i32, %c0_i32_0 : i32, i32, i32
  }
  func.func @transform_4(%arg0: i32, %arg1: i32) -> (i32, i32) {
    %c0_i32 = arith.constant 0 : i32
    %c0_i32_0 = arith.constant 0 : i32
    return %arg1, %c0_i32 : i32, i32
  }
}

</mosaic_0001>

<bundles_post_ra>
// kernel: gnn_forward.1
= control target key start
LH: loop header
LB: loop body
LE: loop exit
PB: predicated region body
PF: predicated region fallthrough
CT: control target
= control target key end

     0   :  { %s1364_s15 = smov 0   ;;  %s1366_s16 = smov 0   ;;  %s1830_s0 = inlined_call_operand.vmem [shape: bf16[128,128], index: 0, kind: input, shape index: {}]   ;;  %s1831_s1 = inlined_call_operand.vmem [shape: bf16[128,128], index: 1, kind: input, shape index: {}]   ;;  %s1832_s2 = inlined_call_operand.vmem [shape: bf16[3,128,128], index: 2, kind: input, shape index: {}]   ;;  %s1833_s3 = inlined_call_operand.vmem [shape: f32[3,1,128], index: 3, kind: input, shape index: {}]   ;;  %s1834_s4 = inlined_call_operand.vmem [shape: f32[128,128], index: 4, kind: output, shape index: {}]  }
   0x1   :  { %s1368_s17 = smov 0  }
   0x2 LB: > { %s26_s18 = sadd.s32 1, %s1333_s16  ;;  %p1070_p0 = scmp.ge.s32.totalorder %s1337_s17, 1  ;;  %s1337_s17 = sphi %s1368_s17, %s14_s17   ;;  %s1333_s16 = sphi %s1366_s16, %s1836_s16   ;;  %s1329_s15 = sphi %s1364_s15, %s1835_s15  }
   0x3   : > { %p28_p1 = scmp.ge.s32.totalorder %s26_s18, 3  ;;  %p193_p2 = scmp.lt.s32.totalorder %s1337_s17, 4 }
   0x5   : > { %s1838_s18 = smov (%p28_p1, %s26_s18), 0  ;;  %p194_p3 = pnand %p1070_p0, %p193_p2 }
   0x6   : > { %p233_p4 = scmp.lt.s32.totalorder (!%p194_p3), %s1329_s15, 2  ;;  %p248_p5 = scmp.eq.s32.totalorder (!%p194_p3), %s1329_s15, 0 }
   0x7   : > { %197 = sbr.rel (%p194_p3) target bundleno = 906 (0x38a), region = 36 }
   0xe   : > { %s1387_s19 = scalar_select %p233_p4, %s1329_s15, 2 }
   0xf   : > { %253 = sbr.rel (!%p248_p5) target bundleno = 22 (0x16), region = 40  ;;  %v1227_v0 = vld [vmem:[%s1831_s1] sm:$0xff] (%p248_p5)   ;;  %v1228_v1 = vld [vmem:[%s1831_s1 + $0x8] sm:$0xff] (%p248_p5)   ;;  %v1229_v2 = vld [vmem:[%s1831_s1 + $0x10] sm:$0xff] (%p248_p5)  }
  0x10   : > { %s1105_s20 = sshll.u32 %s1387_s19, 6  ;;  %s240_s23 = scalar_lea.vmem %s1833_s3, %s1387_s19  ;;  %318 = vst [vmem:[#allocation2] sm:$0xff] (%p248_p5), %v1227_v0  ;;  %319 = vst [vmem:[#allocation2 + $0x8] sm:$0xff] (%p248_p5), %v1228_v1  ;;  %v1230_v3 = vld [vmem:[%s1831_s1 + $0x18] sm:$0xff] (%p248_p5)   ;;  %v1231_v4 = vld [vmem:[%s1831_s1 + $0x20] sm:$0xff] (%p248_p5)  }
  0x11   : > { %s1397_s26 = scalar_lea.vmem %s1832_s2, %s1105_s20  ;;  %320 = vst [vmem:[#allocation2 + $0x10] sm:$0xff] (%p248_p5), %v1229_v2  ;;  %321 = vst [vmem:[#allocation2 + $0x18] sm:$0xff] (%p248_p5), %v1230_v3  ;;  %v1232_v5 = vld [vmem:[%s1831_s1 + $0x28] sm:$0xff] (%p248_p5)   ;;  %v1233_v6 = vld [vmem:[%s1831_s1 + $0x30] sm:$0xff] (%p248_p5)  }
  0x12   : > { %322 = vst [vmem:[#allocation2 + $0x20] sm:$0xff] (%p248_p5), %v1231_v4  ;;  %323 = vst [vmem:[#allocation2 + $0x28] sm:$0xff] (%p248_p5), %v1232_v5  ;;  %v1234_v7 = vld [vmem:[%s1831_s1 + $0x38] sm:$0xff] (%p248_p5)  }
  0x13   : > { %324 = vst [vmem:[#allocation2 + $0x30] sm:$0xff] (%p248_p5), %v1233_v6  ;;  %325 = vst [vmem:[#allocation2 + $0x38] sm:$0xff] (%p248_p5), %v1234_v7 }
  0x16 PF: > { %v1235_v8 = vld [vmem:[%s1397_s26] sm:$0xff]   ;;  %v1236_v9 = vld [vmem:[%s1397_s26 + $0x8] sm:$0xff]   ;;  %v1237_v10 = vld [vmem:[%s1397_s26 + $0x10] sm:$0xff]   ;;  %p1099_p6 = scmp.eq.s32.totalorder %s1329_s15, 2 }
  0x17   : > { %1139 = vmatprep.subr.bf16.mxu0 %v1235_v8  ;;  %v1238_v11 = vld [vmem:[%s1397_s26 + $0x18] sm:$0xff]   ;;  %v329_v12 = vld [vmem:[#allocation2] sm:$0xff]  ;;  %v1240_v14 = vld [vmem:[%s1397_s26 + $0x28] sm:$0xff]  }
  0x18   : > { %1140 = vmatpush3.bf16.msra.mxu0 %v1235_v8  ;;  %1155 = vmatprep.mubr.bf16.mxu0 %v329_v12  ;;  %v1239_v13 = vld [vmem:[%s1397_s26 + $0x20] sm:$0xff]   ;;  %v1241_v15 = vld [vmem:[%s1397_s26 + $0x30] sm:$0xff]   ;;  %v1242_v16 = vld [vmem:[%s1397_s26 + $0x38] sm:$0xff]  }
  0x19   : > { %1141 = vmatprep.subr.bf16.mxu0 %v1236_v9  ;;  %v330_v17 = vld [vmem:[#allocation2 + $0x8] sm:$0xff]  ;;  %v331_v18 = vld [vmem:[#allocation2 + $0x10] sm:$0xff]  ;;  %v332_v19 = vld [vmem:[#allocation2 + $0x18] sm:$0xff] }
  0x1a   : > { %v333_v20 = vld [vmem:[#allocation2 + $0x20] sm:$0xff]  ;;  %v334_v21 = vld [vmem:[#allocation2 + $0x28] sm:$0xff]  ;;  %v335_v22 = vld [vmem:[#allocation2 + $0x30] sm:$0xff] }
  0x1b   : > { %v336_v23 = vld [vmem:[#allocation2 + $0x38] sm:$0xff]  ;;  %v1243_v24 = vld [vmem:[%s1830_s0] sm:$0xff]   ;;  %v1244_v49 = vld [vmem:[%s1830_s0 + $0x8] sm:$0xff]  }
  0x1c   : > { %1142 = vmatpush3.bf16.msra.mxu0 %v1236_v9  ;;  %1187 = vmatprep.mubr.bf16.mxu1 %v1243_v24  ;;  %v1245_v50 = vld [vmem:[%s1830_s0 + $0x10] sm:$0xff]   ;;  %v1246_v51 = vld [vmem:[%s1830_s0 + $0x18] sm:$0xff]   ;;  %v1247_v52 = vld [vmem:[%s1830_s0 + $0x20] sm:$0xff]  }
  0x1d   : > { %1143 = vmatprep.subr.bf16.mxu0 %v1237_v10  ;;  %v1248_v53 = vld [vmem:[%s1830_s0 + $0x28] sm:$0xff]   ;;  %v1249_v54 = vld [vmem:[%s1830_s0 + $0x30] sm:$0xff]   ;;  %v1250_v55 = vld [vmem:[%s1830_s0 + $0x38] sm:$0xff]  }
  0x1e   : > { %v1090_v56 = vld [vmem:[%s240_s23] ss:$0 sm:$0xff] }
  0x20   : > { %1144 = vmatpush3.bf16.msra.mxu0 %v1237_v10 }
  0x21   : > { %1145 = vmatprep.subr.bf16.mxu0 %v1238_v11 }
  0x24   : > { %1146 = vmatpush3.bf16.msra.mxu0 %v1238_v11 }
  0x25   : > { %1147 = vmatprep.subr.bf16.mxu0 %v1239_v13 }
  0x28   : > { %1148 = vmatpush3.bf16.msra.mxu0 %v1239_v13 }
  0x29   : > { %1149 = vmatprep.subr.bf16.mxu0 %v1240_v14 }
  0x2c   : > { %1150 = vmatpush3.bf16.msra.mxu0 %v1240_v14 }
  0x2d   : > { %1151 = vmatprep.subr.bf16.mxu0 %v1241_v15 }
  0x30   : > { %1152 = vmatpush3.bf16.msra.mxu0 %v1241_v15 }
  0x31   : > { %1153 = vmatprep.subr.bf16.mxu0 %v1242_v16 }
  0x34   : > { %1154 = vmatpush3.bf16.msra.mxu0 %v1242_v16 }
  0x37   : > { %1156 = vmatmul.mubr.bf16.vlgmr.msra.gmra.mrb[0].mxu0 %v330_v17 }
  0x38   : > { %1159 = vmatprep.mubr.bf16.mxu0 %v331_v18 }
  0x3f   : > { %1160 = vmatmul.mubr.bf16.gmra.mrb[4].mxu0 %v332_v19 }
  0x40   : > { %1163 = vmatprep.mubr.bf16.mxu0 %v333_v20 }
  0x47   : > { %1164 = vmatmul.mubr.bf16.gmra.mrb[8].mxu0 %v334_v21 }
  0x48   : > { %1167 = vmatprep.mubr.bf16.mxu0 %v335_v22 }
  0x4f   : > { %1168 = vmatmul.mubr.bf16.gmra.mrb[12].mxu0 %v336_v23 }
 0x10a   : > { %v1157_v25 = vpop.f32.mrb[0].mxu0 }
 0x10b   : > { %v435_v26 = vpop.f32.mrb[1].mxu0 }
 0x10c   : > { %v1158_v27 = vpop.f32.mrb[2].mxu0 }
 0x10d   : > { %v499_v28 = vpack.c.bf16 %v1158_v27, %v1157_v25  ;;  %v438_v29 = vpop.f32.mrb[3].mxu0 }
 0x10e   : > { %v498_v30 = vpack.c.bf16 %v438_v29, %v435_v26 }
 0x110   : > { %1171 = vmatprep.subr.bf16.mxu1 %v498_v30 }
 0x111   : > { %1172 = vmatpush3.bf16.msra.mxu1 %v498_v30 }
 0x112   : > { %v1161_v31 = vpop.f32.mrb[4].mxu0  ;;  %1173 = vmatprep.subr.bf16.mxu1 %v499_v28 }
 0x113   : > { %v451_v32 = vpop.f32.mrb[5].mxu0 }
 0x114   : > { %v1162_v33 = vpop.f32.mrb[6].mxu0 }
 0x115   : > { %v501_v34 = vpack.c.bf16 %v1162_v33, %v1161_v31  ;;  %v454_v35 = vpop.f32.mrb[7].mxu0  ;;  %1174 = vmatpush3.bf16.msra.mxu1 %v499_v28 }
 0x116   : > { %v500_v36 = vpack.c.bf16 %v454_v35, %v451_v32 }
 0x118   : > { %1175 = vmatprep.subr.bf16.mxu1 %v500_v36 }
 0x119   : > { %1176 = vmatpush3.bf16.msra.mxu1 %v500_v36 }
 0x11a   : > { %v1165_v37 = vpop.f32.mrb[8].mxu0  ;;  %1177 = vmatprep.subr.bf16.mxu1 %v501_v34 }
 0x11b   : > { %v467_v38 = vpop.f32.mrb[9].mxu0 }
 0x11c   : > { %v1166_v39 = vpop.f32.mrb[10].mxu0 }
 0x11d   : > { %v503_v40 = vpack.c.bf16 %v1166_v39, %v1165_v37  ;;  %v470_v41 = vpop.f32.mrb[11].mxu0  ;;  %1178 = vmatpush3.bf16.msra.mxu1 %v501_v34 }
 0x11e   : > { %v502_v42 = vpack.c.bf16 %v470_v41, %v467_v38 }
 0x120   : > { %1179 = vmatprep.subr.bf16.mxu1 %v502_v42 }
 0x121   : > { %1180 = vmatpush3.bf16.msra.mxu1 %v502_v42 }
 0x122   : > { %v1169_v43 = vpop.f32.mrb[12].mxu0  ;;  %1181 = vmatprep.subr.bf16.mxu1 %v503_v40 }
 0x123   : > { %v483_v44 = vpop.f32.mrb[13].mxu0 }
 0x124   : > { %v1170_v45 = vpop.f32.mrb[14].mxu0 }
 0x125   : > { %v505_v46 = vpack.c.bf16 %v1170_v45, %v1169_v43  ;;  %v486_v47 = vpop.f32.mrb[15].mxu0  ;;  %1182 = vmatpush3.bf16.msra.mxu1 %v503_v40 }
 0x126   : > { %v504_v48 = vpack.c.bf16 %v486_v47, %v483_v44 }
 0x128   : > { %1183 = vmatprep.subr.bf16.mxu1 %v504_v48 }
 0x129   : > { %1184 = vmatpush3.bf16.msra.mxu1 %v504_v48 }
 0x12a   : > { %1185 = vmatprep.subr.bf16.mxu1 %v505_v46 }
 0x12d   : > { %1186 = vmatpush3.bf16.msra.mxu1 %v505_v46 }
 0x130   : > { %1188 = vmatmul.mubr.bf16.vlgmr.msra.gmra.mrb[0].mxu1 %v1244_v49 }
 0x131   : > { %1191 = vmatprep.mubr.bf16.mxu1 %v1245_v50 }
 0x138   : > { %1192 = vmatmul.mubr.bf16.gmra.mrb[4].mxu1 %v1246_v51 }
 0x139   : > { %1195 = vmatprep.mubr.bf16.mxu1 %v1247_v52 }
 0x140   : > { %1196 = vmatmul.mubr.bf16.gmra.mrb[8].mxu1 %v1248_v53 }
 0x141   : > { %1199 = vmatprep.mubr.bf16.mxu1 %v1249_v54 }
 0x148   : > { %1200 = vmatmul.mubr.bf16.gmra.mrb[12].mxu1 %v1250_v55 }
 0x203   : > { %v1189_v57 = vpop.f32.mrb[0].mxu1 }
 0x204   : > { %v636_v58 = vadd.f32 %v1189_v57, %v1090_v56  ;;  %v627_v59 = vpop.f32.mrb[1].mxu1 }
 0x205   : > { %v628_v60 = vadd.f32 %v1090_v56, %v627_v59  ;;  %v1190_v61 = vpop.f32.mrb[2].mxu1 }
 0x206   : > { %v1460_v62 = vmax.f32 %v636_v58, 0.0  ;;  %v639_v63 = vadd.f32 %v1190_v61, %v1090_v56  ;;  %v630_v0 = vpop.f32.mrb[3].mxu1 }
 0x207   : > { %v1462_v1 = vmax.f32 %v628_v60, 0.0  ;;  %v631_v2 = vadd.f32 %v1090_v56, %v630_v0 }
 0x208   : > { %v1464_v3 = vmax.f32 %v639_v63, 0.0  ;;  %733 = vst [vmem:[%s1834_s4 + $0x10] sm:$0xff] (!%p1099_p6), %v1460_v62 }
 0x209   : > { %v1466_v4 = vmax.f32 %v631_v2, 0.0  ;;  %731 = vst [vmem:[%s1834_s4] sm:$0xff] (!%p1099_p6), %v1462_v1 }
 0x20a   : > { %v712_v42 = vpack.c.bf16 (!%p1099_p6), %v1464_v3, %v1460_v62  ;;  %734 = vst [vmem:[%s1834_s4 + $0x18] sm:$0xff] (!%p1099_p6), %v1464_v3 }
 0x20b   : > { %v1193_v5 = vpop.f32.mrb[4].mxu1  ;;  %v711_v41 = vpack.c.bf16 (!%p1099_p6), %v1466_v4, %v1462_v1  ;;  %732 = vst [vmem:[%s1834_s4 + $0x8] sm:$0xff] (!%p1099_p6), %v1466_v4 }
 0x20c   : > { %v652_v6 = vadd.f32 %v1193_v5, %v1090_v56  ;;  %v643_v7 = vpop.f32.mrb[5].mxu1  ;;  %724 = vst [vmem:[#allocation2 + $0x8] sm:$0xff] (!%p1099_p6), %v712_v42 }
 0x20d   : > { %v644_v8 = vadd.f32 %v1090_v56, %v643_v7  ;;  %v1194_v9 = vpop.f32.mrb[6].mxu1  ;;  %723 = vst [vmem:[#allocation2] sm:$0xff] (!%p1099_p6), %v711_v41 }
 0x20e   : > { %v1468_v10 = vmax.f32 %v652_v6, 0.0  ;;  %v655_v11 = vadd.f32 %v1194_v9, %v1090_v56  ;;  %v646_v12 = vpop.f32.mrb[7].mxu1 }
 0x20f   : > { %v1470_v13 = vmax.f32 %v644_v8, 0.0  ;;  %v647_v14 = vadd.f32 %v1090_v56, %v646_v12 }
 0x210   : > { %v1472_v15 = vmax.f32 %v655_v11, 0.0  ;;  %737 = vst [vmem:[%s1834_s4 + $0x30] sm:$0xff] (!%p1099_p6), %v1468_v10 }
 0x211   : > { %v1474_v16 = vmax.f32 %v647_v14, 0.0  ;;  %735 = vst [vmem:[%s1834_s4 + $0x20] sm:$0xff] (!%p1099_p6), %v1470_v13 }
 0x212   : > { %v714_v44 = vpack.c.bf16 (!%p1099_p6), %v1472_v15, %v1468_v10  ;;  %738 = vst [vmem:[%s1834_s4 + $0x38] sm:$0xff] (!%p1099_p6), %v1472_v15 }
 0x213   : > { %v1197_v17 = vpop.f32.mrb[8].mxu1  ;;  %v713_v43 = vpack.c.bf16 (!%p1099_p6), %v1474_v16, %v1470_v13  ;;  %736 = vst [vmem:[%s1834_s4 + $0x28] sm:$0xff] (!%p1099_p6), %v1474_v16 }
 0x214   : > { %v668_v18 = vadd.f32 %v1197_v17, %v1090_v56  ;;  %v659_v19 = vpop.f32.mrb[9].mxu1  ;;  %726 = vst [vmem:[#allocation2 + $0x18] sm:$0xff] (!%p1099_p6), %v714_v44 }
 0x215   : > { %v660_v20 = vadd.f32 %v1090_v56, %v659_v19  ;;  %v1198_v21 = vpop.f32.mrb[10].mxu1  ;;  %725 = vst [vmem:[#allocation2 + $0x10] sm:$0xff] (!%p1099_p6), %v713_v43 }
 0x216   : > { %v1476_v22 = vmax.f32 %v668_v18, 0.0  ;;  %v671_v23 = vadd.f32 %v1198_v21, %v1090_v56  ;;  %v662_v24 = vpop.f32.mrb[11].mxu1 }
 0x217   : > { %v1478_v25 = vmax.f32 %v660_v20, 0.0  ;;  %v663_v26 = vadd.f32 %v1090_v56, %v662_v24 }
 0x218   : > { %v1480_v27 = vmax.f32 %v671_v23, 0.0  ;;  %741 = vst [vmem:[%s1834_s4 + $0x50] sm:$0xff] (!%p1099_p6), %v1476_v22 }
 0x219   : > { %v1482_v28 = vmax.f32 %v663_v26, 0.0  ;;  %739 = vst [vmem:[%s1834_s4 + $0x40] sm:$0xff] (!%p1099_p6), %v1478_v25 }
 0x21a   : > { %742 = vst [vmem:[%s1834_s4 + $0x58] sm:$0xff] (!%p1099_p6), %v1480_v27  ;;  %v716_v46 = vpack.c.bf16 (!%p1099_p6), %v1480_v27, %v1476_v22 }
 0x21b   : > { %v1201_v29 = vpop.f32.mrb[12].mxu1  ;;  %709 = sbr.rel (%p1099_p6) target bundleno = 550 (0x226), region = 48  ;;  %740 = vst [vmem:[%s1834_s4 + $0x48] sm:$0xff] (!%p1099_p6), %v1482_v28  ;;  %v715_v45 = vpack.c.bf16 (!%p1099_p6), %v1482_v28, %v1478_v25 }
 0x21c   : > { %v684_v30 = vadd.f32 %v1201_v29, %v1090_v56  ;;  %v675_v31 = vpop.f32.mrb[13].mxu1  ;;  %728 = vst [vmem:[#allocation2 + $0x28] sm:$0xff] (!%p1099_p6), %v716_v46 }
 0x21d   : > { %v676_v32 = vadd.f32 %v1090_v56, %v675_v31  ;;  %v1202_v33 = vpop.f32.mrb[14].mxu1  ;;  %727 = vst [vmem:[#allocation2 + $0x20] sm:$0xff] (!%p1099_p6), %v715_v45 }
 0x21e   : > { %v1484_v34 = vmax.f32 %v684_v30, 0.0  ;;  %v687_v35 = vadd.f32 %v1202_v33, %v1090_v56  ;;  %v678_v36 = vpop.f32.mrb[15].mxu1 }
 0x21f   : > { %v1486_v37 = vmax.f32 %v676_v32, 0.0  ;;  %v679_v38 = vadd.f32 %v1090_v56, %v678_v36 }
 0x220   : > { %v1488_v39 = vmax.f32 %v687_v35, 0.0  ;;  %745 = vst [vmem:[%s1834_s4 + $0x70] sm:$0xff] (!%p1099_p6), %v1484_v34 }
 0x221   : > { %v1490_v40 = vmax.f32 %v679_v38, 0.0  ;;  %743 = vst [vmem:[%s1834_s4 + $0x60] sm:$0xff] (!%p1099_p6), %v1486_v37 }
 0x222   : > { %746 = vst [vmem:[%s1834_s4 + $0x78] sm:$0xff] %v1488_v39  ;;  %v718_v48 = vpack.c.bf16 %v1488_v39, %v1484_v34 }
 0x223   : > { %744 = vst [vmem:[%s1834_s4 + $0x68] sm:$0xff] %v1490_v40  ;;  %v717_v47 = vpack.c.bf16 %v1490_v40, %v1486_v37 }
 0x224   : > { %730 = vst [vmem:[#allocation2 + $0x38] sm:$0xff] %v718_v48 }
 0x225   : > { %729 = vst [vmem:[#allocation2 + $0x30] sm:$0xff] %v717_v47 }
 0x226 PF: > { %p1100_p7 = scmp.ne.s32.totalorder %s1329_s15, 2 }
 0x227   : > { %v751_v49 = vlaneseq (!%p1100_p7) }
 0x228   : > { %750 = sbr.rel (%p1100_p7) target bundleno = 906 (0x38a), region = 52 }
 0x229   : > { %v1574_v50 = vand.u32 (!%p1100_p7), 127, %v751_v49 }
 0x22b   : > { %vm753_vm0 = vcmp.lt.s32.totalorder (!%p1100_p7), %v1574_v50, 8 }
 0x22c   : > { %v754_v51 = vsel (!%p1100_p7), %vm753_vm0, %v1462_v1, -1e+30  ;;  %v756_v52 = vsel (!%p1100_p7), %vm753_vm0, %v1460_v62, -1e+30  ;;  %v755_v53 = vsel (!%p1100_p7), %vm753_vm0, %v1466_v4, -1e+30 }
 0x22d   : > { %770 = vmax.xlane.f32.xlu0 (!%p1100_p7), %v754_v51  ;;  %774 = vmax.xlane.f32.xlu1 (!%p1100_p7), %v756_v52  ;;  %v757_v54 = vsel (!%p1100_p7), %vm753_vm0, %v1464_v3, -1e+30  ;;  %v758_v55 = vsel (!%p1100_p7), %vm753_vm0, %v1470_v13, -1e+30  ;;  %v759_v56 = vsel (!%p1100_p7), %vm753_vm0, %v1474_v16, -1e+30 }
 0x22e   : > { %v760_v57 = vsel (!%p1100_p7), %vm753_vm0, %v1468_v10, -1e+30  ;;  %v761_v58 = vsel (!%p1100_p7), %vm753_vm0, %v1472_v15, -1e+30  ;;  %v762_v59 = vsel (!%p1100_p7), %vm753_vm0, %v1478_v25, -1e+30 }
 0x22f   : > { %v763_v60 = vsel %vm753_vm0, %v1482_v28, -1e+30  ;;  %v764_v61 = vsel %vm753_vm0, %v1476_v22, -1e+30  ;;  %v1613_v62 = vsel %vm753_vm0, %v1480_v27, -1e+30 }
 0x230   : > { %v1619_v63 = vsel %vm753_vm0, %v1486_v37, -1e+30  ;;  %v1624_v0 = vsel %vm753_vm0, %v1490_v40, -1e+30  ;;  %v1631_v1 = vsel %vm753_vm0, %v1484_v34, -1e+30 }
 0x231   : > { %772 = vmax.xlane.f32.xlu0 %v755_v53  ;;  %776 = vmax.xlane.f32.xlu1 %v757_v54  ;;  %v1636_v2 = vsel %vm753_vm0, %v1488_v39, -1e+30 }
 0x235   : > { %778 = vmax.xlane.f32.xlu0 %v758_v55  ;;  %780 = vmax.xlane.f32.xlu1 %v759_v56 }
 0x239   : > { %782 = vmax.xlane.f32.xlu0 %v760_v57  ;;  %784 = vmax.xlane.f32.xlu1 %v761_v58 }
 0x23d   : > { %786 = vmax.xlane.f32.xlu0 %v762_v59  ;;  %788 = vmax.xlane.f32.xlu1 %v763_v60 }
 0x241   : > { %790 = vmax.xlane.f32.xlu0 %v764_v61  ;;  %792 = vmax.xlane.f32.xlu1 %v1613_v62 }
 0x245   : > { %794 = vmax.xlane.f32.xlu0 %v1619_v63  ;;  %796 = vmax.xlane.f32.xlu1 %v1624_v0 }
 0x249   : > { %798 = vmax.xlane.f32.xlu0 %v1631_v1  ;;  %800 = vmax.xlane.f32.xlu1 %v1636_v2 }
 0x2ba   : > { %v771_v3 = vpop.xlane.xlu0 %770  ;;  %v775_v4 = vpop.xlane.xlu1 %774 }
 0x2bb   : > { %v1640_v5 = vsub.f32 %v754_v51, %v771_v3  ;;  %v1642_v6 = vsub.f32 %v756_v52, %v775_v4 }
 0x2bd   : > { %v818_v7 = vmul.f32 1.442695, %v1640_v5  ;;  %v822_v8 = vmul.f32 1.442695, %v1642_v6 }
 0x2be   : > { %v773_v9 = vpop.xlane.xlu0 %772  ;;  %v777_v10 = vpop.xlane.xlu1 %776 }
 0x2bf   : > { %1251 = vpow2.f32 %v818_v7  ;;  %v1646_v11 = vsub.f32 %v755_v53, %v773_v9  ;;  %v1648_v12 = vsub.f32 %v757_v54, %v777_v10 }
 0x2c0   : > { %1253 = vpow2.f32 %v822_v8 }
 0x2c1   : > { %v820_v13 = vmul.f32 1.442695, %v1646_v11  ;;  %v824_v14 = vmul.f32 1.442695, %v1648_v12 }
 0x2c2   : > { %v779_v15 = vpop.xlane.xlu0 %778  ;;  %v781_v16 = vpop.xlane.xlu1 %780 }
 0x2c3   : > { %1255 = vpow2.f32 %v820_v13  ;;  %v1652_v17 = vsub.f32 %v758_v55, %v779_v15  ;;  %v1654_v18 = vsub.f32 %v759_v56, %v781_v16 }
 0x2c4   : > { %1257 = vpow2.f32 %v824_v14 }
 0x2c5   : > { %v826_v19 = vmul.f32 1.442695, %v1652_v17  ;;  %v828_v20 = vmul.f32 1.442695, %v1654_v18 }
 0x2c6   : > { %v783_v21 = vpop.xlane.xlu0 %782  ;;  %v785_v22 = vpop.xlane.xlu1 %784 }
 0x2c7   : > { %1259 = vpow2.f32 %v826_v19  ;;  %v1658_v23 = vsub.f32 %v760_v57, %v783_v21  ;;  %v1660_v24 = vsub.f32 %v761_v58, %v785_v22 }
 0x2c8   : > { %1261 = vpow2.f32 %v828_v20 }
 0x2c9   : > { %v1252_v25 = vpop.eup %1251  ;;  %v830_v26 = vmul.f32 1.442695, %v1658_v23  ;;  %v832_v27 = vmul.f32 1.442695, %v1660_v24 }
 0x2ca   : > { %v1254_v28 = vpop.eup %1253  ;;  %v787_v29 = vpop.xlane.xlu0 %786  ;;  %v850_v30 = vsel %vm753_vm0, %v1252_v25, 0.0 }
 0x2cb   : > { %v789_v31 = vpop.xlane.xlu1 %788  ;;  %1263 = vpow2.f32 %v830_v26  ;;  %v1666_v32 = vsub.f32 %v762_v59, %v787_v29  ;;  %866 = vadd.xlane.f32.xlu0 %v850_v30  ;;  %v852_v34 = vsel %vm753_vm0, %v1254_v28, 0.0 }
 0x2cc   : > { %v1668_v33 = vsub.f32 %v763_v60, %v789_v31  ;;  %1265 = vpow2.f32 %v832_v27 }
 0x2cd   : > { %v1256_v35 = vpop.eup %1255  ;;  %v834_v36 = vmul.f32 1.442695, %v1666_v32 }
 0x2ce   : > { %v836_v37 = vmul.f32 1.442695, %v1668_v33  ;;  %v1258_v38 = vpop.eup %1257  ;;  %v791_v39 = vpop.xlane.xlu0 %790  ;;  %v851_v40 = vsel %vm753_vm0, %v1256_v35, 0.0 }
 0x2cf   : > { %v793_v41 = vpop.xlane.xlu1 %792  ;;  %1267 = vpow2.f32 %v834_v36  ;;  %v1676_v42 = vsub.f32 %v764_v61, %v791_v39  ;;  %870 = vadd.xlane.f32.xlu0 %v852_v34  ;;  %868 = vadd.xlane.f32.xlu1 %v851_v40  ;;  %v853_v44 = vsel %vm753_vm0, %v1258_v38, 0.0 }
 0x2d0   : > { %v1679_v43 = vsub.f32 %v1613_v62, %v793_v41  ;;  %1269 = vpow2.f32 %v836_v37 }
 0x2d1   : > { %v1260_v45 = vpop.eup %1259  ;;  %v838_v46 = vmul.f32 1.442695, %v1676_v42 }
 0x2d2   : > { %v840_v47 = vmul.f32 1.442695, %v1679_v43  ;;  %v1262_v48 = vpop.eup %1261  ;;  %v795_v49 = vpop.xlane.xlu0 %794  ;;  %v854_v51 = vsel %vm753_vm0, %v1260_v45, 0.0 }
 0x2d3   : > { %v797_v52 = vpop.xlane.xlu1 %796  ;;  %1271 = vpow2.f32 %v838_v46  ;;  %v1688_v53 = vsub.f32 %v1619_v63, %v795_v49  ;;  %872 = vadd.xlane.f32.xlu1 %v853_v44  ;;  %874 = vadd.xlane.f32.xlu0 %v854_v51  ;;  %v855_v55 = vsel %vm753_vm0, %v1262_v48, 0.0 }
 0x2d4   : > { %v1691_v54 = vsub.f32 %v1624_v0, %v797_v52  ;;  %1273 = vpow2.f32 %v840_v47 }
 0x2d5   : > { %v1264_v56 = vpop.eup %1263  ;;  %v842_v57 = vmul.f32 1.442695, %v1688_v53 }
 0x2d6   : > { %v844_v58 = vmul.f32 1.442695, %v1691_v54  ;;  %v1266_v59 = vpop.eup %1265  ;;  %v799_v60 = vpop.xlane.xlu0 %798  ;;  %v856_v61 = vsel %vm753_vm0, %v1264_v56, 0.0 }
 0x2d7   : > { %v801_v62 = vpop.xlane.xlu1 %800  ;;  %1275 = vpow2.f32 %v842_v57  ;;  %v1700_v63 = vsub.f32 %v1631_v1, %v799_v60  ;;  %876 = vadd.xlane.f32.xlu1 %v855_v55  ;;  %878 = vadd.xlane.f32.xlu0 %v856_v61  ;;  %v857_v3 = vsel %vm753_vm0, %v1266_v59, 0.0 }
 0x2d8   : > { %v1703_v0 = vsub.f32 %v1636_v2, %v801_v62  ;;  %1277 = vpow2.f32 %v844_v58 }
 0x2d9   : > { %v1268_v4 = vpop.eup %1267  ;;  %v846_v7 = vmul.f32 1.442695, %v1700_v63 }
 0x2da   : > { %v848_v8 = vmul.f32 1.442695, %v1703_v0  ;;  %v1270_v9 = vpop.eup %1269  ;;  %v858_v10 = vsel %vm753_vm0, %v1268_v4, 0.0 }
 0x2db   : > { %1279 = vpow2.f32 %v846_v7  ;;  %880 = vadd.xlane.f32.xlu1 %v857_v3  ;;  %882 = vadd.xlane.f32.xlu0 %v858_v10  ;;  %v859_v1 = vsel %vm753_vm0, %v1270_v9, 0.0 }
 0x2dc   : > { %1281 = vpow2.f32 %v848_v8 }
 0x2dd   : > { %v1272_v2 = vpop.eup %1271 }
 0x2de   : > { %v1274_v13 = vpop.eup %1273  ;;  %v860_v14 = vsel %vm753_vm0, %v1272_v2, 0.0 }
 0x2df   : > { %884 = vadd.xlane.f32.xlu1 %v859_v1  ;;  %886 = vadd.xlane.f32.xlu0 %v860_v14  ;;  %v861_v15 = vsel %vm753_vm0, %v1274_v13, 0.0 }
 0x2e1   : > { %v1276_v16 = vpop.eup %1275 }
 0x2e2   : > { %v1278_v19 = vpop.eup %1277  ;;  %v862_v20 = vsel %vm753_vm0, %v1276_v16, 0.0 }
 0x2e3   : > { %888 = vadd.xlane.f32.xlu1 %v861_v15  ;;  %890 = vadd.xlane.f32.xlu0 %v862_v20  ;;  %v863_v21 = vsel %vm753_vm0, %v1278_v19, 0.0 }
 0x2e5   : > { %v1280_v22 = vpop.eup %1279 }
 0x2e6   : > { %v1282_v25 = vpop.eup %1281  ;;  %v864_v26 = vsel %vm753_vm0, %v1280_v22, 0.0 }
 0x2e7   : > { %892 = vadd.xlane.f32.xlu1 %v863_v21  ;;  %894 = vadd.xlane.f32.xlu0 %v864_v26  ;;  %v865_v27 = vsel %vm753_vm0, %v1282_v25, 0.0 }
 0x2eb   : > { %896 = vadd.xlane.f32.xlu1 %v865_v27 }
 0x358   : > { %v867_v28 = vpop.xlane.xlu0 %866 }
 0x359   : > { %1283 = vlog2.f32 %v867_v28 }
 0x35c   : > { %v869_v29 = vpop.xlane.xlu1 %868  ;;  %v871_v30 = vpop.xlane.xlu0 %870 }
 0x35d   : > { %1285 = vlog2.f32 %v869_v29 }
 0x35e   : > { %1287 = vlog2.f32 %v871_v30 }
 0x360   : > { %v873_v31 = vpop.xlane.xlu1 %872  ;;  %v875_v34 = vpop.xlane.xlu0 %874 }
 0x361   : > { %1289 = vlog2.f32 %v873_v31 }
 0x362   : > { %1291 = vlog2.f32 %v875_v34 }
 0x363   : > { %v1284_v35 = vpop.eup %1283 }
 0x364   : > { %v899_v36 = vmul.f32 0.6931472, %v1284_v35  ;;  %v877_v37 = vpop.xlane.xlu1 %876  ;;  %v879_v38 = vpop.xlane.xlu0 %878 }
 0x365   : > { %1293 = vlog2.f32 %v877_v37 }
 0x366   : > { %v930_v39 = vsub.f32 %v1640_v5, %v899_v36  ;;  %1295 = vlog2.f32 %v879_v38 }
 0x367   : > { %v1286_v40 = vpop.eup %1285 }
 0x368   : > { %v1288_v41 = vpop.eup %1287  ;;  %v946_v44 = vsel %vm753_vm0, %v930_v39, 0.0  ;;  %v901_v45 = vmul.f32 0.6931472, %v1286_v40  ;;  %v881_v46 = vpop.xlane.xlu1 %880 }
 0x369   : > { %v883_v47 = vpop.xlane.xlu0 %882  ;;  %962 = vst [vmem:[%s1834_s4] sm:$0xff] %v946_v44  ;;  %v903_v48 = vmul.f32 0.6931472, %v1288_v41  ;;  %1297 = vlog2.f32 %v881_v46 }
 0x36a   : > { %v931_v49 = vsub.f32 %v1646_v11, %v901_v45  ;;  %1299 = vlog2.f32 %v883_v47 }
 0x36b   : > { %v1290_v51 = vpop.eup %1289  ;;  %v932_v5 = vsub.f32 %v1642_v6, %v903_v48 }
 0x36c   : > { %v1292_v52 = vpop.eup %1291  ;;  %v947_v55 = vsel %vm753_vm0, %v931_v49, 0.0  ;;  %v905_v56 = vmul.f32 0.6931472, %v1290_v51  ;;  %v885_v57 = vpop.xlane.xlu1 %884 }
 0x36d   : > { %v887_v58 = vpop.xlane.xlu0 %886  ;;  %963 = vst [vmem:[%s1834_s4 + $0x8] sm:$0xff] %v947_v55  ;;  %v948_v59 = vsel %vm753_vm0, %v932_v5, 0.0  ;;  %v907_v60 = vmul.f32 0.6931472, %v1292_v52  ;;  %1301 = vlog2.f32 %v885_v57 }
 0x36e   : > { %964 = vst [vmem:[%s1834_s4 + $0x10] sm:$0xff] %v948_v59  ;;  %v933_v6 = vsub.f32 %v1648_v12, %v905_v56  ;;  %1303 = vlog2.f32 %v887_v58 }
 0x36f   : > { %v1294_v11 = vpop.eup %1293  ;;  %v934_v61 = vsub.f32 %v1652_v17, %v907_v60 }
 0x370   : > { %v1296_v62 = vpop.eup %1295  ;;  %v949_v3 = vsel %vm753_vm0, %v933_v6, 0.0  ;;  %v909_v4 = vmul.f32 0.6931472, %v1294_v11  ;;  %v889_v7 = vpop.xlane.xlu1 %888 }
 0x371   : > { %v891_v8 = vpop.xlane.xlu0 %890  ;;  %965 = vst [vmem:[%s1834_s4 + $0x18] sm:$0xff] %v949_v3  ;;  %v950_v9 = vsel %vm753_vm0, %v934_v61, 0.0  ;;  %v911_v10 = vmul.f32 0.6931472, %v1296_v62  ;;  %1305 = vlog2.f32 %v889_v7 }
 0x372   : > { %966 = vst [vmem:[%s1834_s4 + $0x20] sm:$0xff] %v950_v9  ;;  %v935_v12 = vsub.f32 %v1654_v18, %v909_v4  ;;  %1307 = vlog2.f32 %v891_v8 }
 0x373   : > { %v1298_v17 = vpop.eup %1297  ;;  %v936_v1 = vsub.f32 %v1658_v23, %v911_v10 }
 0x374   : > { %v1300_v2 = vpop.eup %1299  ;;  %v951_v13 = vsel %vm753_vm0, %v935_v12, 0.0  ;;  %v913_v14 = vmul.f32 0.6931472, %v1298_v17  ;;  %v893_v15 = vpop.xlane.xlu1 %892 }
 0x375   : > { %v895_v16 = vpop.xlane.xlu0 %894  ;;  %967 = vst [vmem:[%s1834_s4 + $0x28] sm:$0xff] %v951_v13  ;;  %v952_v19 = vsel %vm753_vm0, %v936_v1, 0.0  ;;  %v915_v20 = vmul.f32 0.6931472, %v1300_v2  ;;  %1309 = vlog2.f32 %v893_v15 }
 0x376   : > { %968 = vst [vmem:[%s1834_s4 + $0x30] sm:$0xff] %v952_v19  ;;  %v937_v18 = vsub.f32 %v1660_v24, %v913_v14  ;;  %1311 = vlog2.f32 %v895_v16 }
 0x377   : > { %v1302_v23 = vpop.eup %1301  ;;  %v938_v21 = vsub.f32 %v1666_v32, %v915_v20 }
 0x378   : > { %v1304_v22 = vpop.eup %1303  ;;  %v953_v25 = vsel %vm753_vm0, %v937_v18, 0.0  ;;  %v917_v26 = vmul.f32 0.6931472, %v1302_v23  ;;  %v897_v27 = vpop.xlane.xlu1 %896 }
 0x379   : > { %969 = vst [vmem:[%s1834_s4 + $0x38] sm:$0xff] %v953_v25  ;;  %v954_v28 = vsel %vm753_vm0, %v938_v21, 0.0  ;;  %v919_v29 = vmul.f32 0.6931472, %v1304_v22  ;;  %1313 = vlog2.f32 %v897_v27 }
 0x37a   : > { %970 = vst [vmem:[%s1834_s4 + $0x40] sm:$0xff] %v954_v28  ;;  %v939_v24 = vsub.f32 %v1668_v33, %v917_v26 }
 0x37b   : > { %v1306_v32 = vpop.eup %1305  ;;  %v940_v30 = vsub.f32 %v1676_v42, %v919_v29 }
 0x37c   : > { %v1308_v31 = vpop.eup %1307  ;;  %v955_v34 = vsel %vm753_vm0, %v939_v24, 0.0  ;;  %v921_v35 = vmul.f32 0.6931472, %v1306_v32 }
 0x37d   : > { %971 = vst [vmem:[%s1834_s4 + $0x48] sm:$0xff] %v955_v34  ;;  %v956_v36 = vsel %vm753_vm0, %v940_v30, 0.0  ;;  %v923_v37 = vmul.f32 0.6931472, %v1308_v31 }
 0x37e   : > { %972 = vst [vmem:[%s1834_s4 + $0x50] sm:$0xff] %v956_v36  ;;  %v941_v33 = vsub.f32 %v1679_v43, %v921_v35 }
 0x37f   : > { %v1310_v42 = vpop.eup %1309  ;;  %v942_v38 = vsub.f32 %v1688_v53, %v923_v37 }
 0x380   : > { %v1312_v39 = vpop.eup %1311  ;;  %v957_v40 = vsel %vm753_vm0, %v941_v33, 0.0  ;;  %v925_v41 = vmul.f32 0.6931472, %v1310_v42 }
 0x381   : > { %973 = vst [vmem:[%s1834_s4 + $0x58] sm:$0xff] %v957_v40  ;;  %v958_v44 = vsel %vm753_vm0, %v942_v38, 0.0  ;;  %v927_v45 = vmul.f32 0.6931472, %v1312_v39 }
 0x382   : > { %974 = vst [vmem:[%s1834_s4 + $0x60] sm:$0xff] %v958_v44  ;;  %v943_v43 = vsub.f32 %v1691_v54, %v925_v41 }
 0x383   : > { %v1314_v53 = vpop.eup %1313  ;;  %v944_v46 = vsub.f32 %v1700_v63, %v927_v45 }
 0x384   : > { %v959_v47 = vsel %vm753_vm0, %v943_v43, 0.0  ;;  %v929_v48 = vmul.f32 0.6931472, %v1314_v53 }
 0x385   : > { %975 = vst [vmem:[%s1834_s4 + $0x68] sm:$0xff] %v959_v47  ;;  %v960_v49 = vsel %vm753_vm0, %v944_v46, 0.0 }
 0x386   : > { %976 = vst [vmem:[%s1834_s4 + $0x70] sm:$0xff] %v960_v49  ;;  %v945_v54 = vsub.f32 %v1703_v0, %v929_v48 }
 0x388   : > { %v961_v63 = vsel %vm753_vm0, %v945_v54, 0.0 }
 0x389   : > { %977 = vst [vmem:[%s1834_s4 + $0x78] sm:$0xff] %v961_v63 }
 0x38a PF: > { %s14_s17 = sadd.s32 1, %s1337_s17   ;;  %s1835_s15 = smov %s1333_s16 }
 0x38b   : > { %p11_p8 = scmp.ge.s32.totalorder %s14_s17, 5   ;;  %s1836_s16 = smov %s1838_s18 }
 0x38d   :  { %13 = sbr.rel (!%p11_p8) target bundleno = 2 (0x2), region = 89 }

</bundles_post_ra>
